<compile_context>
chip_gen: v5e
topology: v5e:2x2
jax: 0.10.0
libtpu: 0.0.40
codegen_flags: <defaults>
</compile_context>

<pallas_src>
import jax
import jax.numpy as jnp
from jax.experimental import pallas as pl
from jax.experimental.pallas import tpu as pltpu


def _round_up(x, m):
    return (x + m - 1) // m * m


# --------------------------------------------------------------------------
# Kernel 1: gather context-word embedding rows from HBM and sum them (f32).
# --------------------------------------------------------------------------
def _make_cbow_sum_kernel(n_ctx, depth):
    def kernel(ids_ref, emb_hbm_ref, sum_ref, row_buf, sem):
        """ids_ref:     SMEM (n_ctx,) int32 word indices (scalar prefetch)
           emb_hbm_ref: (nwords, emb_size) embedding table left in HBM (pl.ANY)
           sum_ref:     (1, emb_size) f32 output
           row_buf:     VMEM (depth, 1, emb_size) multi-slot gather buffer
           sem:         DMA semaphores (depth,)"""
        emb_size = sum_ref.shape[-1]
        inflight = [None] * depth

        def issue(row_id, slot):
            cp = pltpu.make_async_copy(
                emb_hbm_ref.at[pl.ds(row_id, 1), :],   # data-dependent row gather
                row_buf.at[slot],
                sem.at[slot],
            )
            cp.start()
            inflight[slot] = cp

        # Issue the first `depth` row DMAs up front: all in flight before any wait.
        for s in range(min(depth, n_ctx)):
            issue(ids_ref[s], s)

        acc = jnp.zeros((1, emb_size), jnp.float32)
        for s in range(n_ctx):            # static Python loop: small context window
            slot = s % depth
            # Hoist the next row-id scalar read above the wait (wait breaks
            # SMEM sst->sld forwarding).
            nxt_id = ids_ref[s + depth] if (s + depth) < n_ctx else None
            inflight[slot].wait()
            acc = acc + row_buf[slot].astype(jnp.float32)
            if nxt_id is not None:        # re-issue into the slot we just consumed
                issue(nxt_id, slot)
        sum_ref[...] = acc

    return kernel


def _cbow_sum(words, emb_table, *, max_inflight=8):
    n_ctx = words.shape[0]
    nwords, emb_size = emb_table.shape
    depth = max(1, min(n_ctx, max_inflight))

    grid_spec = pltpu.PrefetchScalarGridSpec(
        num_scalar_prefetch=1,                         # word ids land in SMEM
        grid=(1,),                                     # single step: no per-word grid overhead
        in_specs=[pl.BlockSpec(memory_space=pl.ANY)],  # table stays in HBM
        out_specs=pl.BlockSpec((1, emb_size), lambda i, ids: (0, 0)),
        scratch_shapes=[
            pltpu.VMEM((depth, 1, emb_size), emb_table.dtype),  # gather slots
            pltpu.SemaphoreType.DMA((depth,)),
        ],
    )
    return pl.pallas_call(
        _make_cbow_sum_kernel(n_ctx, depth),
        out_shape=jax.ShapeDtypeStruct((1, emb_size), jnp.float32),
        grid_spec=grid_spec,
        compiler_params=pltpu.CompilerParams(dimension_semantics=("arbitrary",)),
    )(words, emb_table)


# --------------------------------------------------------------------------
# Kernel 2: vocab-tiled projection  (1, E) @ (E, TN)  + bias  -> (1, TN)
# --------------------------------------------------------------------------
def _cbow_proj_kernel(sum_ref, wt_ref, b_ref, out_ref):
    # Keep the bag sum in f32 into the MXU; upcast the W tile (no-op for f32 W).
    logits = jnp.dot(
        sum_ref[...],                                  # (1, E) f32
        wt_ref[...].astype(jnp.float32),               # (E, TN)
        preferred_element_type=jnp.float32,
    )                                                  # (1, TN)
    out_ref[...] = logits + b_ref[...].astype(jnp.float32)   # lane-dense store


def _cbow_proj(emb_sum, w_t, b2d, *, tn):
    emb_size, padded = w_t.shape
    num_tiles = padded // tn

    grid_spec = pltpu.PrefetchScalarGridSpec(
        num_scalar_prefetch=0,
        grid=(num_tiles,),
        in_specs=[
            pl.BlockSpec((1, emb_size), lambda j: (0, 0)),    # bag sum (resident)
            pl.BlockSpec((emb_size, tn), lambda j: (0, j)),   # W^T tile (streamed)
            pl.BlockSpec((1, tn), lambda j: (0, j)),          # bias tile
        ],
        out_specs=pl.BlockSpec((1, tn), lambda j: (0, j)),    # lane-dense output
    )
    return pl.pallas_call(
        _cbow_proj_kernel,
        out_shape=jax.ShapeDtypeStruct((1, padded), jnp.float32),
        grid_spec=grid_spec,
        # Independent vocab tiles: v7x's two TensorCores split them; no-op v5e/v6e.
        compiler_params=pltpu.CompilerParams(dimension_semantics=("parallel",)),
    )(emb_sum, w_t, b2d)


# --------------------------------------------------------------------------
# One-time parameter prep (do at init, NOT per forward call)
# --------------------------------------------------------------------------
def _choose_vocab_tile(nwords, emb_size, itemsize, requested_tn,
                       vmem_budget_bytes=6 * 1024 * 1024):
    # Double-buffered W tile dominates VMEM: 2 * tn * emb_size * itemsize bytes.
    # Budget fits within v5e's 16 MiB scoped default (the smallest of v5e/v6e/v7x).
    cap = max(128, (vmem_budget_bytes // (2 * emb_size * itemsize)) // 128 * 128)
    tn = min(requested_tn, cap, _round_up(nwords, 128))
    return max(128, (tn // 128) * 128)


def prepare_cbow_params(emb_table, proj_w, proj_b, *, tn=2048):
    """emb_table: (nwords, emb_size); proj_w: (nwords, emb_size) PyTorch Linear
    layout; proj_b: (nwords,).  Transposes + pads W ONCE so the per-call forward
    never copies the weight matrix."""
    emb_table = jnp.asarray(emb_table)
    proj_w = jnp.asarray(proj_w)
    proj_b = jnp.asarray(proj_b)
    nwords, emb_size = proj_w.shape
    itemsize = jnp.dtype(proj_w.dtype).itemsize

    tn = _choose_vocab_tile(nwords, emb_size, itemsize, tn)
    padded = _round_up(nwords, tn)

    w_t = proj_w.T                                   # (emb_size, nwords), one-time copy
    if padded != nwords:                             # one-time zero pad of the vocab dim
        w_t = jnp.pad(w_t, ((0, 0), (0, padded - nwords)))
        proj_b = jnp.pad(proj_b, (0, padded - nwords))

    return dict(emb=emb_table, w_t=w_t, b=proj_b.reshape(1, padded),
                nwords=nwords, emb_size=emb_size, tn=tn)


# --------------------------------------------------------------------------
# Module forward
# --------------------------------------------------------------------------
def word_emb_cbow(params, words):
    """params: output of prepare_cbow_params; words: (N,) int context word ids."""
    nwords = params["nwords"]
    emb_size = params["emb_size"]
    n_ctx = words.shape[0]

    if n_ctx == 0:
        emb_sum = jnp.zeros((1, emb_size), jnp.float32)   # empty bag
    else:
        # Clamp ids so a bad index can never issue an out-of-range HBM DMA.
        ids = jnp.clip(jnp.asarray(words, jnp.int32), 0, nwords - 1)
        emb_sum = _cbow_sum(ids, params["emb"])

    out = _cbow_proj(emb_sum, params["w_t"], params["b"], tn=params["tn"])
    return out[:, :nwords]


def word_emb_cbow_ref(words, emb_table, proj_w, proj_b):
    emb = emb_table[words]                       # (N, emb_size)
    emb_sum = emb.sum(axis=0).reshape(1, -1)     # (1, emb_size)
    return emb_sum @ proj_w.T + proj_b[None, :]  # (1, nwords)


if __name__ == "__main__":
    nwords, emb_size, n_ctx = 1000, 128, 8       # exercises vocab padding + multi-slot gather

    key = jax.random.PRNGKey(0)
    k_emb, k_w, k_b, k_ids = jax.random.split(key, 4)

    # Deterministic init matching the module's __init__:
    #   embedding.weight ~ U(-0.25, 0.25); projection.weight ~ U(-0.25, 0.25)
    #   projection.bias  ~ default Linear init U(-1/sqrt(emb_size), 1/sqrt(emb_size))
    emb_table = jax.random.uniform(k_emb, (nwords, emb_size), jnp.float32,
                                   minval=-0.25, maxval=0.25)
    proj_w = jax.random.uniform(k_w, (nwords, emb_size), jnp.float32,
                                minval=-0.25, maxval=0.25)
    bound = 1.0 / (emb_size ** 0.5)
    proj_b = jax.random.uniform(k_b, (nwords,), jnp.float32,
                                minval=-bound, maxval=bound)
    words = jax.random.randint(k_ids, (n_ctx,), 0, nwords, dtype=jnp.int32)

    ref = word_emb_cbow_ref(words, emb_table, proj_w, proj_b)

    # f32 parameters: exact check vs reference.
    params_f32 = prepare_cbow_params(emb_table, proj_w, proj_b)
    out = jax.block_until_ready(word_emb_cbow(params_f32, words))
    assert out.shape == (1, nwords)
    assert jnp.allclose(out, ref, atol=1e-5, rtol=1e-5), "mismatch vs reference (f32)"

    # bf16 parameter streaming (halves dominant W HBM traffic); f32 accumulation
    # and f32 LHS into the MXU, so only bf16 quantization error remains.
    params_bf16 = prepare_cbow_params(emb_table.astype(jnp.bfloat16),
                                      proj_w.astype(jnp.bfloat16),
                                      proj_b)
    out_bf16 = jax.block_until_ready(word_emb_cbow(params_bf16, words))
    assert jnp.allclose(out_bf16, ref, atol=5e-2, rtol=5e-2), "mismatch vs reference (bf16)"

    print("KERNEL_OK")
</pallas_src>

<mosaic_0001>
module attributes {stable_mosaic.version = 11 : i64} {
  func.func @kernel(%arg0: i32, %arg1: memref<8xi32, #tpu.memory_space<smem>>, %arg2: memref<1000x128xf32, #tpu.memory_space<any>>, %arg3: memref<1x128xf32, #tpu.memory_space<vmem>>, %arg4: memref<8x1x128xf32, #tpu.memory_space<vmem>>, %arg5: memref<8x!tpu.dma_semaphore, #tpu.memory_space<semaphore_mem>>) attributes {dimension_semantics = [#tpu.dimension_semantics<arbitrary>], iteration_bounds = array<i64: 1>, scalar_prefetch = 1 : i64, scratch_operands = 2 : i64, tpu.core_type = #tpu.core_type<tc>, window_params = [{}, {pipeline_mode = #tpu.pipeline_mode<synchronous>, transform_indices = @transform_1, window_bounds = array<i64: 1, 128>}]} {
    %c0 = arith.constant 0 : index
    %0 = memref.load %arg1[%c0] : memref<8xi32, #tpu.memory_space<smem>>
    %c0_i32 = arith.constant 0 : i32
    %c0_i32_0 = arith.constant 0 : i32
    %c0_i32_1 = arith.constant 0 : i32
    %1 = tpu.memref_slice %arg2[%0, %c0_i32_1] : memref<1000x128xf32, #tpu.memory_space<any>> -> memref<1x128xf32, #tpu.memory_space<any>>
    %c0_i32_2 = arith.constant 0 : i32
    %c0_i32_3 = arith.constant 0 : i32
    %2 = tpu.memref_slice %arg4[%c0_i32, %c0_i32_2, %c0_i32_3] : memref<8x1x128xf32, #tpu.memory_space<vmem>> -> memref<1x1x128xf32, #tpu.memory_space<vmem>>
    %3 = tpu.memref_squeeze %2 : memref<1x1x128xf32, #tpu.memory_space<vmem>> -> memref<1x128xf32, #tpu.memory_space<vmem>>
    %4 = tpu.memref_slice %arg5[%c0_i32_0] : memref<8x!tpu.dma_semaphore, #tpu.memory_space<semaphore_mem>> -> memref<1x!tpu.dma_semaphore, #tpu.memory_space<semaphore_mem>>
    %5 = tpu.memref_squeeze %4 : memref<1x!tpu.dma_semaphore, #tpu.memory_space<semaphore_mem>> -> memref<!tpu.dma_semaphore, #tpu.memory_space<semaphore_mem>>
    tpu.enqueue_dma source(%1 : memref<1x128xf32, #tpu.memory_space<any>>) target(%3 : memref<1x128xf32, #tpu.memory_space<vmem>>) target_semaphore(%5 : memref<!tpu.dma_semaphore, #tpu.memory_space<semaphore_mem>>)
    %c1 = arith.constant 1 : index
    %6 = memref.load %arg1[%c1] : memref<8xi32, #tpu.memory_space<smem>>
    %c1_i32 = arith.constant 1 : i32
    %c1_i32_4 = arith.constant 1 : i32
    %c0_i32_5 = arith.constant 0 : i32
    %7 = tpu.memref_slice %arg2[%6, %c0_i32_5] : memref<1000x128xf32, #tpu.memory_space<any>> -> memref<1x128xf32, #tpu.memory_space<any>>
    %c0_i32_6 = arith.constant 0 : i32
    %c0_i32_7 = arith.constant 0 : i32
    %8 = tpu.memref_slice %arg4[%c1_i32, %c0_i32_6, %c0_i32_7] : memref<8x1x128xf32, #tpu.memory_space<vmem>> -> memref<1x1x128xf32, #tpu.memory_space<vmem>>
    %9 = tpu.memref_squeeze %8 : memref<1x1x128xf32, #tpu.memory_space<vmem>> -> memref<1x128xf32, #tpu.memory_space<vmem>>
    %10 = tpu.memref_slice %arg5[%c1_i32_4] : memref<8x!tpu.dma_semaphore, #tpu.memory_space<semaphore_mem>> -> memref<1x!tpu.dma_semaphore, #tpu.memory_space<semaphore_mem>>
    %11 = tpu.memref_squeeze %10 : memref<1x!tpu.dma_semaphore, #tpu.memory_space<semaphore_mem>> -> memref<!tpu.dma_semaphore, #tpu.memory_space<semaphore_mem>>
    tpu.enqueue_dma source(%7 : memref<1x128xf32, #tpu.memory_space<any>>) target(%9 : memref<1x128xf32, #tpu.memory_space<vmem>>) target_semaphore(%11 : memref<!tpu.dma_semaphore, #tpu.memory_space<semaphore_mem>>)
    %c2 = arith.constant 2 : index
    %12 = memref.load %arg1[%c2] : memref<8xi32, #tpu.memory_space<smem>>
    %c2_i32 = arith.constant 2 : i32
    %c2_i32_8 = arith.constant 2 : i32
    %c0_i32_9 = arith.constant 0 : i32
    %13 = tpu.memref_slice %arg2[%12, %c0_i32_9] : memref<1000x128xf32, #tpu.memory_space<any>> -> memref<1x128xf32, #tpu.memory_space<any>>
    %c0_i32_10 = arith.constant 0 : i32
    %c0_i32_11 = arith.constant 0 : i32
    %14 = tpu.memref_slice %arg4[%c2_i32, %c0_i32_10, %c0_i32_11] : memref<8x1x128xf32, #tpu.memory_space<vmem>> -> memref<1x1x128xf32, #tpu.memory_space<vmem>>
    %15 = tpu.memref_squeeze %14 : memref<1x1x128xf32, #tpu.memory_space<vmem>> -> memref<1x128xf32, #tpu.memory_space<vmem>>
    %16 = tpu.memref_slice %arg5[%c2_i32_8] : memref<8x!tpu.dma_semaphore, #tpu.memory_space<semaphore_mem>> -> memref<1x!tpu.dma_semaphore, #tpu.memory_space<semaphore_mem>>
    %17 = tpu.memref_squeeze %16 : memref<1x!tpu.dma_semaphore, #tpu.memory_space<semaphore_mem>> -> memref<!tpu.dma_semaphore, #tpu.memory_space<semaphore_mem>>
    tpu.enqueue_dma source(%13 : memref<1x128xf32, #tpu.memory_space<any>>) target(%15 : memref<1x128xf32, #tpu.memory_space<vmem>>) target_semaphore(%17 : memref<!tpu.dma_semaphore, #tpu.memory_space<semaphore_mem>>)
    %c3 = arith.constant 3 : index
    %18 = memref.load %arg1[%c3] : memref<8xi32, #tpu.memory_space<smem>>
    %c3_i32 = arith.constant 3 : i32
    %c3_i32_12 = arith.constant 3 : i32
    %c0_i32_13 = arith.constant 0 : i32
    %19 = tpu.memref_slice %arg2[%18, %c0_i32_13] : memref<1000x128xf32, #tpu.memory_space<any>> -> memref<1x128xf32, #tpu.memory_space<any>>
    %c0_i32_14 = arith.constant 0 : i32
    %c0_i32_15 = arith.constant 0 : i32
    %20 = tpu.memref_slice %arg4[%c3_i32, %c0_i32_14, %c0_i32_15] : memref<8x1x128xf32, #tpu.memory_space<vmem>> -> memref<1x1x128xf32, #tpu.memory_space<vmem>>
    %21 = tpu.memref_squeeze %20 : memref<1x1x128xf32, #tpu.memory_space<vmem>> -> memref<1x128xf32, #tpu.memory_space<vmem>>
    %22 = tpu.memref_slice %arg5[%c3_i32_12] : memref<8x!tpu.dma_semaphore, #tpu.memory_space<semaphore_mem>> -> memref<1x!tpu.dma_semaphore, #tpu.memory_space<semaphore_mem>>
    %23 = tpu.memref_squeeze %22 : memref<1x!tpu.dma_semaphore, #tpu.memory_space<semaphore_mem>> -> memref<!tpu.dma_semaphore, #tpu.memory_space<semaphore_mem>>
    tpu.enqueue_dma source(%19 : memref<1x128xf32, #tpu.memory_space<any>>) target(%21 : memref<1x128xf32, #tpu.memory_space<vmem>>) target_semaphore(%23 : memref<!tpu.dma_semaphore, #tpu.memory_space<semaphore_mem>>)
    %c4 = arith.constant 4 : index
    %24 = memref.load %arg1[%c4] : memref<8xi32, #tpu.memory_space<smem>>
    %c4_i32 = arith.constant 4 : i32
    %c4_i32_16 = arith.constant 4 : i32
    %c0_i32_17 = arith.constant 0 : i32
    %25 = tpu.memref_slice %arg2[%24, %c0_i32_17] : memref<1000x128xf32, #tpu.memory_space<any>> -> memref<1x128xf32, #tpu.memory_space<any>>
    %c0_i32_18 = arith.constant 0 : i32
    %c0_i32_19 = arith.constant 0 : i32
    %26 = tpu.memref_slice %arg4[%c4_i32, %c0_i32_18, %c0_i32_19] : memref<8x1x128xf32, #tpu.memory_space<vmem>> -> memref<1x1x128xf32, #tpu.memory_space<vmem>>
    %27 = tpu.memref_squeeze %26 : memref<1x1x128xf32, #tpu.memory_space<vmem>> -> memref<1x128xf32, #tpu.memory_space<vmem>>
    %28 = tpu.memref_slice %arg5[%c4_i32_16] : memref<8x!tpu.dma_semaphore, #tpu.memory_space<semaphore_mem>> -> memref<1x!tpu.dma_semaphore, #tpu.memory_space<semaphore_mem>>
    %29 = tpu.memref_squeeze %28 : memref<1x!tpu.dma_semaphore, #tpu.memory_space<semaphore_mem>> -> memref<!tpu.dma_semaphore, #tpu.memory_space<semaphore_mem>>
    tpu.enqueue_dma source(%25 : memref<1x128xf32, #tpu.memory_space<any>>) target(%27 : memref<1x128xf32, #tpu.memory_space<vmem>>) target_semaphore(%29 : memref<!tpu.dma_semaphore, #tpu.memory_space<semaphore_mem>>)
    %c5 = arith.constant 5 : index
    %30 = memref.load %arg1[%c5] : memref<8xi32, #tpu.memory_space<smem>>
    %c5_i32 = arith.constant 5 : i32
    %c5_i32_20 = arith.constant 5 : i32
    %c0_i32_21 = arith.constant 0 : i32
    %31 = tpu.memref_slice %arg2[%30, %c0_i32_21] : memref<1000x128xf32, #tpu.memory_space<any>> -> memref<1x128xf32, #tpu.memory_space<any>>
    %c0_i32_22 = arith.constant 0 : i32
    %c0_i32_23 = arith.constant 0 : i32
    %32 = tpu.memref_slice %arg4[%c5_i32, %c0_i32_22, %c0_i32_23] : memref<8x1x128xf32, #tpu.memory_space<vmem>> -> memref<1x1x128xf32, #tpu.memory_space<vmem>>
    %33 = tpu.memref_squeeze %32 : memref<1x1x128xf32, #tpu.memory_space<vmem>> -> memref<1x128xf32, #tpu.memory_space<vmem>>
    %34 = tpu.memref_slice %arg5[%c5_i32_20] : memref<8x!tpu.dma_semaphore, #tpu.memory_space<semaphore_mem>> -> memref<1x!tpu.dma_semaphore, #tpu.memory_space<semaphore_mem>>
    %35 = tpu.memref_squeeze %34 : memref<1x!tpu.dma_semaphore, #tpu.memory_space<semaphore_mem>> -> memref<!tpu.dma_semaphore, #tpu.memory_space<semaphore_mem>>
    tpu.enqueue_dma source(%31 : memref<1x128xf32, #tpu.memory_space<any>>) target(%33 : memref<1x128xf32, #tpu.memory_space<vmem>>) target_semaphore(%35 : memref<!tpu.dma_semaphore, #tpu.memory_space<semaphore_mem>>)
    %c6 = arith.constant 6 : index
    %36 = memref.load %arg1[%c6] : memref<8xi32, #tpu.memory_space<smem>>
    %c6_i32 = arith.constant 6 : i32
    %c6_i32_24 = arith.constant 6 : i32
    %c0_i32_25 = arith.constant 0 : i32
    %37 = tpu.memref_slice %arg2[%36, %c0_i32_25] : memref<1000x128xf32, #tpu.memory_space<any>> -> memref<1x128xf32, #tpu.memory_space<any>>
    %c0_i32_26 = arith.constant 0 : i32
    %c0_i32_27 = arith.constant 0 : i32
    %38 = tpu.memref_slice %arg4[%c6_i32, %c0_i32_26, %c0_i32_27] : memref<8x1x128xf32, #tpu.memory_space<vmem>> -> memref<1x1x128xf32, #tpu.memory_space<vmem>>
    %39 = tpu.memref_squeeze %38 : memref<1x1x128xf32, #tpu.memory_space<vmem>> -> memref<1x128xf32, #tpu.memory_space<vmem>>
    %40 = tpu.memref_slice %arg5[%c6_i32_24] : memref<8x!tpu.dma_semaphore, #tpu.memory_space<semaphore_mem>> -> memref<1x!tpu.dma_semaphore, #tpu.memory_space<semaphore_mem>>
    %41 = tpu.memref_squeeze %40 : memref<1x!tpu.dma_semaphore, #tpu.memory_space<semaphore_mem>> -> memref<!tpu.dma_semaphore, #tpu.memory_space<semaphore_mem>>
    tpu.enqueue_dma source(%37 : memref<1x128xf32, #tpu.memory_space<any>>) target(%39 : memref<1x128xf32, #tpu.memory_space<vmem>>) target_semaphore(%41 : memref<!tpu.dma_semaphore, #tpu.memory_space<semaphore_mem>>)
    %c7 = arith.constant 7 : index
    %42 = memref.load %arg1[%c7] : memref<8xi32, #tpu.memory_space<smem>>
    %c7_i32 = arith.constant 7 : i32
    %c7_i32_28 = arith.constant 7 : i32
    %c0_i32_29 = arith.constant 0 : i32
    %43 = tpu.memref_slice %arg2[%42, %c0_i32_29] : memref<1000x128xf32, #tpu.memory_space<any>> -> memref<1x128xf32, #tpu.memory_space<any>>
    %c0_i32_30 = arith.constant 0 : i32
    %c0_i32_31 = arith.constant 0 : i32
    %44 = tpu.memref_slice %arg4[%c7_i32, %c0_i32_30, %c0_i32_31] : memref<8x1x128xf32, #tpu.memory_space<vmem>> -> memref<1x1x128xf32, #tpu.memory_space<vmem>>
    %45 = tpu.memref_squeeze %44 : memref<1x1x128xf32, #tpu.memory_space<vmem>> -> memref<1x128xf32, #tpu.memory_space<vmem>>
    %46 = tpu.memref_slice %arg5[%c7_i32_28] : memref<8x!tpu.dma_semaphore, #tpu.memory_space<semaphore_mem>> -> memref<1x!tpu.dma_semaphore, #tpu.memory_space<semaphore_mem>>
    %47 = tpu.memref_squeeze %46 : memref<1x!tpu.dma_semaphore, #tpu.memory_space<semaphore_mem>> -> memref<!tpu.dma_semaphore, #tpu.memory_space<semaphore_mem>>
    tpu.enqueue_dma source(%43 : memref<1x128xf32, #tpu.memory_space<any>>) target(%45 : memref<1x128xf32, #tpu.memory_space<vmem>>) target_semaphore(%47 : memref<!tpu.dma_semaphore, #tpu.memory_space<semaphore_mem>>)
    %cst = arith.constant 0.000000e+00 : f32
    %48 = vector.broadcast %cst : f32 to vector<1x128xf32>
    %c0_i32_32 = arith.constant 0 : i32
    %c0_i32_33 = arith.constant 0 : i32
    %c0_i32_34 = arith.constant 0 : i32
    %49 = tpu.memref_slice %arg2[%0, %c0_i32_34] : memref<1000x128xf32, #tpu.memory_space<any>> -> memref<1x128xf32, #tpu.memory_space<any>>
    %c0_i32_35 = arith.constant 0 : i32
    %c0_i32_36 = arith.constant 0 : i32
    %50 = tpu.memref_slice %arg4[%c0_i32_32, %c0_i32_35, %c0_i32_36] : memref<8x1x128xf32, #tpu.memory_space<vmem>> -> memref<1x1x128xf32, #tpu.memory_space<vmem>>
    %51 = tpu.memref_squeeze %50 : memref<1x1x128xf32, #tpu.memory_space<vmem>> -> memref<1x128xf32, #tpu.memory_space<vmem>>
    %52 = tpu.memref_slice %arg5[%c0_i32_33] : memref<8x!tpu.dma_semaphore, #tpu.memory_space<semaphore_mem>> -> memref<1x!tpu.dma_semaphore, #tpu.memory_space<semaphore_mem>>
    %53 = tpu.memref_squeeze %52 : memref<1x!tpu.dma_semaphore, #tpu.memory_space<semaphore_mem>> -> memref<!tpu.dma_semaphore, #tpu.memory_space<semaphore_mem>>
    tpu.wait_dma2 semaphore(%53 : memref<!tpu.dma_semaphore, #tpu.memory_space<semaphore_mem>>) src(%49 : memref<1x128xf32, #tpu.memory_space<any>>) dst(%51 : memref<1x128xf32, #tpu.memory_space<vmem>>)
    %c0_37 = arith.constant 0 : index
    %c0_38 = arith.constant 0 : index
    %c0_39 = arith.constant 0 : index
    %54 = vector.load %arg4[%c0_37, %c0_38, %c0_39] : memref<8x1x128xf32, #tpu.memory_space<vmem>>, vector<1x1x128xf32>
    %55 = vector.shape_cast %54 : vector<1x1x128xf32> to vector<1x128xf32>
    %56 = arith.addf %48, %55 : vector<1x128xf32>
    %c1_i32_40 = arith.constant 1 : i32
    %c1_i32_41 = arith.constant 1 : i32
    %c0_i32_42 = arith.constant 0 : i32
    %57 = tpu.memref_slice %arg2[%6, %c0_i32_42] : memref<1000x128xf32, #tpu.memory_space<any>> -> memref<1x128xf32, #tpu.memory_space<any>>
    %c0_i32_43 = arith.constant 0 : i32
    %c0_i32_44 = arith.constant 0 : i32
    %58 = tpu.memref_slice %arg4[%c1_i32_40, %c0_i32_43, %c0_i32_44] : memref<8x1x128xf32, #tpu.memory_space<vmem>> -> memref<1x1x128xf32, #tpu.memory_space<vmem>>
    %59 = tpu.memref_squeeze %58 : memref<1x1x128xf32, #tpu.memory_space<vmem>> -> memref<1x128xf32, #tpu.memory_space<vmem>>
    %60 = tpu.memref_slice %arg5[%c1_i32_41] : memref<8x!tpu.dma_semaphore, #tpu.memory_space<semaphore_mem>> -> memref<1x!tpu.dma_semaphore, #tpu.memory_space<semaphore_mem>>
    %61 = tpu.memref_squeeze %60 : memref<1x!tpu.dma_semaphore, #tpu.memory_space<semaphore_mem>> -> memref<!tpu.dma_semaphore, #tpu.memory_space<semaphore_mem>>
    tpu.wait_dma2 semaphore(%61 : memref<!tpu.dma_semaphore, #tpu.memory_space<semaphore_mem>>) src(%57 : memref<1x128xf32, #tpu.memory_space<any>>) dst(%59 : memref<1x128xf32, #tpu.memory_space<vmem>>)
    %c1_45 = arith.constant 1 : index
    %c0_46 = arith.constant 0 : index
    %c0_47 = arith.constant 0 : index
    %62 = vector.load %arg4[%c1_45, %c0_46, %c0_47] : memref<8x1x128xf32, #tpu.memory_space<vmem>>, vector<1x1x128xf32>
    %63 = vector.shape_cast %62 : vector<1x1x128xf32> to vector<1x128xf32>
    %64 = arith.addf %56, %63 : vector<1x128xf32>
    %c2_i32_48 = arith.constant 2 : i32
    %c2_i32_49 = arith.constant 2 : i32
    %c0_i32_50 = arith.constant 0 : i32
    %65 = tpu.memref_slice %arg2[%12, %c0_i32_50] : memref<1000x128xf32, #tpu.memory_space<any>> -> memref<1x128xf32, #tpu.memory_space<any>>
    %c0_i32_51 = arith.constant 0 : i32
    %c0_i32_52 = arith.constant 0 : i32
    %66 = tpu.memref_slice %arg4[%c2_i32_48, %c0_i32_51, %c0_i32_52] : memref<8x1x128xf32, #tpu.memory_space<vmem>> -> memref<1x1x128xf32, #tpu.memory_space<vmem>>
    %67 = tpu.memref_squeeze %66 : memref<1x1x128xf32, #tpu.memory_space<vmem>> -> memref<1x128xf32, #tpu.memory_space<vmem>>
    %68 = tpu.memref_slice %arg5[%c2_i32_49] : memref<8x!tpu.dma_semaphore, #tpu.memory_space<semaphore_mem>> -> memref<1x!tpu.dma_semaphore, #tpu.memory_space<semaphore_mem>>
    %69 = tpu.memref_squeeze %68 : memref<1x!tpu.dma_semaphore, #tpu.memory_space<semaphore_mem>> -> memref<!tpu.dma_semaphore, #tpu.memory_space<semaphore_mem>>
    tpu.wait_dma2 semaphore(%69 : memref<!tpu.dma_semaphore, #tpu.memory_space<semaphore_mem>>) src(%65 : memref<1x128xf32, #tpu.memory_space<any>>) dst(%67 : memref<1x128xf32, #tpu.memory_space<vmem>>)
    %c2_53 = arith.constant 2 : index
    %c0_54 = arith.constant 0 : index
    %c0_55 = arith.constant 0 : index
    %70 = vector.load %arg4[%c2_53, %c0_54, %c0_55] : memref<8x1x128xf32, #tpu.memory_space<vmem>>, vector<1x1x128xf32>
    %71 = vector.shape_cast %70 : vector<1x1x128xf32> to vector<1x128xf32>
    %72 = arith.addf %64, %71 : vector<1x128xf32>
    %c3_i32_56 = arith.constant 3 : i32
    %c3_i32_57 = arith.constant 3 : i32
    %c0_i32_58 = arith.constant 0 : i32
    %73 = tpu.memref_slice %arg2[%18, %c0_i32_58] : memref<1000x128xf32, #tpu.memory_space<any>> -> memref<1x128xf32, #tpu.memory_space<any>>
    %c0_i32_59 = arith.constant 0 : i32
    %c0_i32_60 = arith.constant 0 : i32
    %74 = tpu.memref_slice %arg4[%c3_i32_56, %c0_i32_59, %c0_i32_60] : memref<8x1x128xf32, #tpu.memory_space<vmem>> -> memref<1x1x128xf32, #tpu.memory_space<vmem>>
    %75 = tpu.memref_squeeze %74 : memref<1x1x128xf32, #tpu.memory_space<vmem>> -> memref<1x128xf32, #tpu.memory_space<vmem>>
    %76 = tpu.memref_slice %arg5[%c3_i32_57] : memref<8x!tpu.dma_semaphore, #tpu.memory_space<semaphore_mem>> -> memref<1x!tpu.dma_semaphore, #tpu.memory_space<semaphore_mem>>
    %77 = tpu.memref_squeeze %76 : memref<1x!tpu.dma_semaphore, #tpu.memory_space<semaphore_mem>> -> memref<!tpu.dma_semaphore, #tpu.memory_space<semaphore_mem>>
    tpu.wait_dma2 semaphore(%77 : memref<!tpu.dma_semaphore, #tpu.memory_space<semaphore_mem>>) src(%73 : memref<1x128xf32, #tpu.memory_space<any>>) dst(%75 : memref<1x128xf32, #tpu.memory_space<vmem>>)
    %c3_61 = arith.constant 3 : index
    %c0_62 = arith.constant 0 : index
    %c0_63 = arith.constant 0 : index
    %78 = vector.load %arg4[%c3_61, %c0_62, %c0_63] : memref<8x1x128xf32, #tpu.memory_space<vmem>>, vector<1x1x128xf32>
    %79 = vector.shape_cast %78 : vector<1x1x128xf32> to vector<1x128xf32>
    %80 = arith.addf %72, %79 : vector<1x128xf32>
    %c4_i32_64 = arith.constant 4 : i32
    %c4_i32_65 = arith.constant 4 : i32
    %c0_i32_66 = arith.constant 0 : i32
    %81 = tpu.memref_slice %arg2[%24, %c0_i32_66] : memref<1000x128xf32, #tpu.memory_space<any>> -> memref<1x128xf32, #tpu.memory_space<any>>
    %c0_i32_67 = arith.constant 0 : i32
    %c0_i32_68 = arith.constant 0 : i32
    %82 = tpu.memref_slice %arg4[%c4_i32_64, %c0_i32_67, %c0_i32_68] : memref<8x1x128xf32, #tpu.memory_space<vmem>> -> memref<1x1x128xf32, #tpu.memory_space<vmem>>
    %83 = tpu.memref_squeeze %82 : memref<1x1x128xf32, #tpu.memory_space<vmem>> -> memref<1x128xf32, #tpu.memory_space<vmem>>
    %84 = tpu.memref_slice %arg5[%c4_i32_65] : memref<8x!tpu.dma_semaphore, #tpu.memory_space<semaphore_mem>> -> memref<1x!tpu.dma_semaphore, #tpu.memory_space<semaphore_mem>>
    %85 = tpu.memref_squeeze %84 : memref<1x!tpu.dma_semaphore, #tpu.memory_space<semaphore_mem>> -> memref<!tpu.dma_semaphore, #tpu.memory_space<semaphore_mem>>
    tpu.wait_dma2 semaphore(%85 : memref<!tpu.dma_semaphore, #tpu.memory_space<semaphore_mem>>) src(%81 : memref<1x128xf32, #tpu.memory_space<any>>) dst(%83 : memref<1x128xf32, #tpu.memory_space<vmem>>)
    %c4_69 = arith.constant 4 : index
    %c0_70 = arith.constant 0 : index
    %c0_71 = arith.constant 0 : index
    %86 = vector.load %arg4[%c4_69, %c0_70, %c0_71] : memref<8x1x128xf32, #tpu.memory_space<vmem>>, vector<1x1x128xf32>
    %87 = vector.shape_cast %86 : vector<1x1x128xf32> to vector<1x128xf32>
    %88 = arith.addf %80, %87 : vector<1x128xf32>
    %c5_i32_72 = arith.constant 5 : i32
    %c5_i32_73 = arith.constant 5 : i32
    %c0_i32_74 = arith.constant 0 : i32
    %89 = tpu.memref_slice %arg2[%30, %c0_i32_74] : memref<1000x128xf32, #tpu.memory_space<any>> -> memref<1x128xf32, #tpu.memory_space<any>>
    %c0_i32_75 = arith.constant 0 : i32
    %c0_i32_76 = arith.constant 0 : i32
    %90 = tpu.memref_slice %arg4[%c5_i32_72, %c0_i32_75, %c0_i32_76] : memref<8x1x128xf32, #tpu.memory_space<vmem>> -> memref<1x1x128xf32, #tpu.memory_space<vmem>>
    %91 = tpu.memref_squeeze %90 : memref<1x1x128xf32, #tpu.memory_space<vmem>> -> memref<1x128xf32, #tpu.memory_space<vmem>>
    %92 = tpu.memref_slice %arg5[%c5_i32_73] : memref<8x!tpu.dma_semaphore, #tpu.memory_space<semaphore_mem>> -> memref<1x!tpu.dma_semaphore, #tpu.memory_space<semaphore_mem>>
    %93 = tpu.memref_squeeze %92 : memref<1x!tpu.dma_semaphore, #tpu.memory_space<semaphore_mem>> -> memref<!tpu.dma_semaphore, #tpu.memory_space<semaphore_mem>>
    tpu.wait_dma2 semaphore(%93 : memref<!tpu.dma_semaphore, #tpu.memory_space<semaphore_mem>>) src(%89 : memref<1x128xf32, #tpu.memory_space<any>>) dst(%91 : memref<1x128xf32, #tpu.memory_space<vmem>>)
    %c5_77 = arith.constant 5 : index
    %c0_78 = arith.constant 0 : index
    %c0_79 = arith.constant 0 : index
    %94 = vector.load %arg4[%c5_77, %c0_78, %c0_79] : memref<8x1x128xf32, #tpu.memory_space<vmem>>, vector<1x1x128xf32>
    %95 = vector.shape_cast %94 : vector<1x1x128xf32> to vector<1x128xf32>
    %96 = arith.addf %88, %95 : vector<1x128xf32>
    %c6_i32_80 = arith.constant 6 : i32
    %c6_i32_81 = arith.constant 6 : i32
    %c0_i32_82 = arith.constant 0 : i32
    %97 = tpu.memref_slice %arg2[%36, %c0_i32_82] : memref<1000x128xf32, #tpu.memory_space<any>> -> memref<1x128xf32, #tpu.memory_space<any>>
    %c0_i32_83 = arith.constant 0 : i32
    %c0_i32_84 = arith.constant 0 : i32
    %98 = tpu.memref_slice %arg4[%c6_i32_80, %c0_i32_83, %c0_i32_84] : memref<8x1x128xf32, #tpu.memory_space<vmem>> -> memref<1x1x128xf32, #tpu.memory_space<vmem>>
    %99 = tpu.memref_squeeze %98 : memref<1x1x128xf32, #tpu.memory_space<vmem>> -> memref<1x128xf32, #tpu.memory_space<vmem>>
    %100 = tpu.memref_slice %arg5[%c6_i32_81] : memref<8x!tpu.dma_semaphore, #tpu.memory_space<semaphore_mem>> -> memref<1x!tpu.dma_semaphore, #tpu.memory_space<semaphore_mem>>
    %101 = tpu.memref_squeeze %100 : memref<1x!tpu.dma_semaphore, #tpu.memory_space<semaphore_mem>> -> memref<!tpu.dma_semaphore, #tpu.memory_space<semaphore_mem>>
    tpu.wait_dma2 semaphore(%101 : memref<!tpu.dma_semaphore, #tpu.memory_space<semaphore_mem>>) src(%97 : memref<1x128xf32, #tpu.memory_space<any>>) dst(%99 : memref<1x128xf32, #tpu.memory_space<vmem>>)
    %c6_85 = arith.constant 6 : index
    %c0_86 = arith.constant 0 : index
    %c0_87 = arith.constant 0 : index
    %102 = vector.load %arg4[%c6_85, %c0_86, %c0_87] : memref<8x1x128xf32, #tpu.memory_space<vmem>>, vector<1x1x128xf32>
    %103 = vector.shape_cast %102 : vector<1x1x128xf32> to vector<1x128xf32>
    %104 = arith.addf %96, %103 : vector<1x128xf32>
    %c7_i32_88 = arith.constant 7 : i32
    %c7_i32_89 = arith.constant 7 : i32
    %c0_i32_90 = arith.constant 0 : i32
    %105 = tpu.memref_slice %arg2[%42, %c0_i32_90] : memref<1000x128xf32, #tpu.memory_space<any>> -> memref<1x128xf32, #tpu.memory_space<any>>
    %c0_i32_91 = arith.constant 0 : i32
    %c0_i32_92 = arith.constant 0 : i32
    %106 = tpu.memref_slice %arg4[%c7_i32_88, %c0_i32_91, %c0_i32_92] : memref<8x1x128xf32, #tpu.memory_space<vmem>> -> memref<1x1x128xf32, #tpu.memory_space<vmem>>
    %107 = tpu.memref_squeeze %106 : memref<1x1x128xf32, #tpu.memory_space<vmem>> -> memref<1x128xf32, #tpu.memory_space<vmem>>
    %108 = tpu.memref_slice %arg5[%c7_i32_89] : memref<8x!tpu.dma_semaphore, #tpu.memory_space<semaphore_mem>> -> memref<1x!tpu.dma_semaphore, #tpu.memory_space<semaphore_mem>>
    %109 = tpu.memref_squeeze %108 : memref<1x!tpu.dma_semaphore, #tpu.memory_space<semaphore_mem>> -> memref<!tpu.dma_semaphore, #tpu.memory_space<semaphore_mem>>
    tpu.wait_dma2 semaphore(%109 : memref<!tpu.dma_semaphore, #tpu.memory_space<semaphore_mem>>) src(%105 : memref<1x128xf32, #tpu.memory_space<any>>) dst(%107 : memref<1x128xf32, #tpu.memory_space<vmem>>)
    %c7_93 = arith.constant 7 : index
    %c0_94 = arith.constant 0 : index
    %c0_95 = arith.constant 0 : index
    %110 = vector.load %arg4[%c7_93, %c0_94, %c0_95] : memref<8x1x128xf32, #tpu.memory_space<vmem>>, vector<1x1x128xf32>
    %111 = vector.shape_cast %110 : vector<1x1x128xf32> to vector<1x128xf32>
    %112 = arith.addf %104, %111 : vector<1x128xf32>
    %c0_96 = arith.constant 0 : index
    %c0_97 = arith.constant 0 : index
    %113 = vector.load %arg3[%c0_96, %c0_97] : memref<1x128xf32, #tpu.memory_space<vmem>>, vector<1x128xf32>
    tpu.vector_store %arg3[%c0_96, %c0_97], %112 {strides = array<i32>} : memref<1x128xf32, #tpu.memory_space<vmem>>, vector<1x128xf32>,
    return
  }
  func.func @transform_1(%arg0: i32, %arg1: memref<8xi32, #tpu.memory_space<smem>>) -> (i32, i32) {
    %c0_i32 = arith.constant 0 : i32
    %c0_i32_0 = arith.constant 0 : i32
    %c0_i32_1 = arith.constant 0 : i32
    return %c0_i32, %c0_i32_0 : i32, i32
  }
}

</mosaic_0001>

<bundles_post_ra>
// kernel: tpu_custom_call.1
= control target key start
LH: loop header
LB: loop body
LE: loop exit
PB: predicated region body
PF: predicated region fallthrough
CT: control target
= control target key end

     0   :  { %s536_s12 = smov [#allocation5]   ;;  %s652_s0 = inlined_call_operand.hbm [shape: s32[8], index: 0, kind: input, shape index: {}]   ;;  %s653_s1 = inlined_call_operand.hbm [shape: f32[1000,128], index: 1, kind: input, shape index: {}]   ;;  %s654_s2 = inlined_call_operand.hbm [shape: f32[1,128], index: 2, kind: output, shape index: {}]  }
   0x1   :  { %s8_s11 = sshll.u32 %s652_s0, 4  ;;  %s9_s11 = int_to_ptr.hbm [resolvable:$true] %s8_s11 }
   0x2   :  { %11 = dma.hbm_to_smem %s9_s11, 16, %s536_s12, [#allocation4] }
   0x3   :  { %516 = dma.done.wait [#allocation4], 16 }
   0x4   :  { %517 = vsyncadd [#allocation4], 4294967280 }
   0x5   :  { %14 = sfence }
   0x6   :  { %15 = vsyncpa [#allocation7], 0  ;;  %s16_s13 = sld [smem:[#allocation5]]  ;;  %s537_s14 = smov [#allocation2]  }
   0x7   :  { %s27_s15 = sshll.u32 %s537_s14, 4  ;;  %s263_s16 = sld [smem:[#allocation5 + $0x1]]  ;;  %s28_s15 = int_to_ptr.vmem [resolvable:$true] %s27_s15 }
   0x8   :  { %s538_s17 = smov [#allocation2 + $0x1]   ;;  %s566_s19 = sld [smem:[#allocation5 + $0x2]] }
   0x9   :  { %s564_s18 = sshll.u32 %s538_s17, 4  ;;  %s539_s0 = smov [#allocation2 + $0x2]   ;;  %s45_s18 = int_to_ptr.vmem [resolvable:$true] %s564_s18 }
   0xa   :  { %s569_s20 = sshll.u32 %s539_s0, 4  ;;  %s571_s21 = sld [smem:[#allocation5 + $0x3]]  ;;  %s62_s20 = int_to_ptr.vmem [resolvable:$true] %s569_s20 }
   0xb   :  { %s583_s6 = scalar_lea.hbm %s653_s1, 1000 }
   0xc   :  { %s17_s24 = scalar_lea.hbm %s653_s1, %s16_s13 }
   0xd   :  { %s25_s25 = sshll.u32 %s17_s24, 4  ;;  %s32_s28 = scalar_lea.hbm %s653_s1, %s263_s16  ;;  %s26_s25 = int_to_ptr.hbm [resolvable:$true] %s25_s25 }
   0xe   :  { %s42_s29 = sshll.u32 %s32_s28, 4  ;;  %s300_s30 = sshra.s32 %s26_s25, 4  ;;  %s301_s30 = int_to_ptr.hbm [resolvable:$true] %s300_s30  ;;  %s43_s29 = int_to_ptr.hbm [resolvable:$true] %s42_s29 }
   0xf   :  { %s302_s3 = scalar_lea.hbm %s301_s30, 1  ;;  %p305_p1 = scmp.lt.s32.totalorder %s301_s30, %s653_s1 }
  0x10   :  { %p303_p0 = scmp.ne.s32.totalorder %s301_s30, %s302_s3  ;;  %p306_p2 = scmp.lt.s32.totalorder %s583_s6, %s302_s3 }
  0x12   :  { %p307_p3 = por %p306_p2, %p305_p1 }
  0x14   :  { %p308_p4 = pnand %p307_p3, %p303_p0 }
  0x16   :  { %311 = shalt.err (!%p308_p4)  }
  0x17   :  { %30 = dma.hbm_to_vmem [thread:$0]  %s26_s25, 16, %s28_s15, [#allocation3] }
  0x18   :  { %s49_s11 = scalar_lea.hbm %s653_s1, %s566_s19  ;;  %s324_s12 = sshra.s32 %s43_s29, 4  ;;  %s325_s12 = int_to_ptr.hbm [resolvable:$true] %s324_s12 }
  0x19   :  { %s326_s13 = scalar_lea.hbm %s325_s12, 1  ;;  %p329_p6 = scmp.lt.s32.totalorder %s325_s12, %s653_s1 }
  0x1a   :  { %p327_p5 = scmp.ne.s32.totalorder %s325_s12, %s326_s13  ;;  %p330_p7 = scmp.lt.s32.totalorder %s583_s6, %s326_s13 }
  0x1c   :  { %p331_p8 = por %p330_p7, %p329_p6 }
  0x1e   :  { %p332_p9 = pnand %p331_p8, %p327_p5 }
  0x20   :  { %335 = shalt.err (!%p332_p9)  }
  0x21   :  { %47 = dma.hbm_to_vmem [thread:$0]  %s43_s29, 16, %s45_s18, [#allocation3 + $0x1] }
  0x22   :  { %s59_s15 = sshll.u32 %s49_s11, 4  ;;  %s66_s0 = scalar_lea.hbm %s653_s1, %s571_s21  ;;  %s60_s15 = int_to_ptr.hbm [resolvable:$true] %s59_s15 }
  0x23   :  { %s76_s22 = sshll.u32 %s66_s0, 4  ;;  %s348_s23 = sshra.s32 %s60_s15, 4  ;;  %s349_s23 = int_to_ptr.hbm [resolvable:$true] %s348_s23  ;;  %s77_s22 = int_to_ptr.hbm [resolvable:$true] %s76_s22 }
  0x24   :  { %s350_s24 = scalar_lea.hbm %s349_s23, 1  ;;  %p353_p11 = scmp.lt.s32.totalorder %s349_s23, %s653_s1 }
  0x25   :  { %p351_p10 = scmp.ne.s32.totalorder %s349_s23, %s350_s24  ;;  %p354_p12 = scmp.lt.s32.totalorder %s583_s6, %s350_s24 }
  0x27   :  { %p355_p13 = por %p354_p12, %p353_p11 }
  0x29   :  { %p356_p0 = pnand %p355_p13, %p351_p10 }
  0x2b   :  { %359 = shalt.err (!%p356_p0)  }
  0x2c   :  { %64 = dma.hbm_to_vmem [thread:$0]  %s60_s15, 16, %s62_s20, [#allocation3 + $0x2] }
  0x2d   :  { %s540_s18 = smov [#allocation2 + $0x3]   ;;  %s266_s27 = sld [smem:[#allocation5 + $0x4]] }
  0x2e   :  { %s78_s21 = sshll.u32 %s540_s18, 4  ;;  %s372_s28 = sshra.s32 %s77_s22, 4  ;;  %s79_s21 = int_to_ptr.vmem [resolvable:$true] %s78_s21  ;;  %s373_s28 = int_to_ptr.hbm [resolvable:$true] %s372_s28 }
  0x2f   :  { %s374_s29 = scalar_lea.hbm %s373_s28, 1  ;;  %p377_p2 = scmp.lt.s32.totalorder %s373_s28, %s653_s1 }
  0x30   :  { %p375_p1 = scmp.ne.s32.totalorder %s373_s28, %s374_s29  ;;  %p378_p3 = scmp.lt.s32.totalorder %s583_s6, %s374_s29 }
  0x32   :  { %p379_p4 = por %p378_p3, %p377_p2 }
  0x34   :  { %p380_p5 = pnand %p379_p4, %p375_p1 }
  0x36   :  { %383 = shalt.err (!%p380_p5)  }
  0x37   :  { %81 = dma.hbm_to_vmem [thread:$0]  %s77_s22, 16, %s79_s21, [#allocation3 + $0x3] }
  0x38   :  { %s541_s4 = smov [#allocation2 + $0x4]   ;;  %s267_s5 = sld [smem:[#allocation5 + $0x5]] }
  0x39   :  { %s95_s20 = sshll.u32 %s541_s4, 4  ;;  %s542_s7 = smov [#allocation2 + $0x5]   ;;  %s96_s20 = int_to_ptr.vmem [resolvable:$true] %s95_s20 }
  0x3a   :  { %s613_s8 = sshll.u32 %s542_s7, 4  ;;  %s268_s9 = sld [smem:[#allocation5 + $0x6]]  ;;  %s113_s8 = int_to_ptr.vmem [resolvable:$true] %s613_s8 }
  0x3b   :  { %s83_s12 = scalar_lea.hbm %s653_s1, %s266_s27  ;;  %s543_s14 = smov [#allocation2 + $0x6]  }
  0x3c   :  { %s93_s13 = sshll.u32 %s83_s12, 4  ;;  %s619_s16 = sshll.u32 %s543_s14, 4  ;;  %s94_s13 = int_to_ptr.hbm [resolvable:$true] %s93_s13  ;;  %s130_s16 = int_to_ptr.vmem [resolvable:$true] %s619_s16 }
  0x3d   :  { %s396_s15 = sshra.s32 %s94_s13, 4  ;;  %s397_s15 = int_to_ptr.hbm [resolvable:$true] %s396_s15 }
  0x3e   :  { %s398_s17 = scalar_lea.hbm %s397_s15, 1  ;;  %p401_p7 = scmp.lt.s32.totalorder %s397_s15, %s653_s1 }
  0x3f   :  { %p399_p6 = scmp.ne.s32.totalorder %s397_s15, %s398_s17  ;;  %p402_p8 = scmp.lt.s32.totalorder %s583_s6, %s398_s17 }
  0x41   :  { %p403_p9 = por %p402_p8, %p401_p7 }
  0x43   :  { %p404_p10 = pnand %p403_p9, %p399_p6 }
  0x45   :  { %407 = shalt.err (!%p404_p10)  }
  0x46   :  { %98 = dma.hbm_to_vmem [thread:$0]  %s94_s13, 16, %s96_s20, [#allocation3 + $0x4] }
  0x47   :  { %s100_s24 = scalar_lea.hbm %s653_s1, %s267_s5  ;;  %s117_s21 = scalar_lea.hbm %s653_s1, %s268_s9 }
  0x48   :  { %s110_s25 = sshll.u32 %s100_s24, 4  ;;  %s127_s27 = sshll.u32 %s117_s21, 4  ;;  %s111_s25 = int_to_ptr.hbm [resolvable:$true] %s110_s25  ;;  %s128_s27 = int_to_ptr.hbm [resolvable:$true] %s127_s27 }
  0x49   :  { %s420_s28 = sshra.s32 %s111_s25, 4  ;;  %s421_s28 = int_to_ptr.hbm [resolvable:$true] %s420_s28 }
  0x4a   :  { %s422_s29 = scalar_lea.hbm %s421_s28, 1  ;;  %p425_p12 = scmp.lt.s32.totalorder %s421_s28, %s653_s1 }
  0x4b   :  { %p423_p11 = scmp.ne.s32.totalorder %s421_s28, %s422_s29  ;;  %p426_p13 = scmp.lt.s32.totalorder %s583_s6, %s422_s29 }
  0x4d   :  { %p427_p0 = por %p426_p13, %p425_p12 }
  0x4f   :  { %p428_p1 = pnand %p427_p0, %p423_p11 }
  0x51   :  { %431 = shalt.err (!%p428_p1)  }
  0x52   :  { %115 = dma.hbm_to_vmem [thread:$0]  %s111_s25, 16, %s113_s8, [#allocation3 + $0x5] }
  0x53   :  { %s269_s4 = sld [smem:[#allocation5 + $0x7]]  ;;  %s444_s20 = sshra.s32 %s128_s27, 4  ;;  %s445_s20 = int_to_ptr.hbm [resolvable:$true] %s444_s20 }
  0x54   :  { %s446_s5 = scalar_lea.hbm %s445_s20, 1  ;;  %p449_p3 = scmp.lt.s32.totalorder %s445_s20, %s653_s1 }
  0x55   :  { %p447_p2 = scmp.ne.s32.totalorder %s445_s20, %s446_s5  ;;  %p450_p4 = scmp.lt.s32.totalorder %s583_s6, %s446_s5 }
  0x57   :  { %p451_p5 = por %p450_p4, %p449_p3 }
  0x59   :  { %p452_p6 = pnand %p451_p5, %p447_p2 }
  0x5b   :  { %455 = shalt.err (!%p452_p6)  }
  0x5c   :  { %132 = dma.hbm_to_vmem [thread:$0]  %s128_s27, 16, %s130_s16, [#allocation3 + $0x6] }
  0x5d   :  { %s544_s10 = smov [#allocation2 + $0x7]   ;;  %s134_s13 = scalar_lea.hbm %s653_s1, %s269_s4 }
  0x5e   :  { %s146_s11 = sshll.u32 %s544_s10, 4  ;;  %s144_s14 = sshll.u32 %s134_s13, 4  ;;  %s147_s11 = int_to_ptr.vmem [resolvable:$true] %s146_s11  ;;  %s145_s14 = int_to_ptr.hbm [resolvable:$true] %s144_s14 }
  0x5f   :  { %s468_s15 = sshra.s32 %s145_s14, 4  ;;  %s469_s15 = int_to_ptr.hbm [resolvable:$true] %s468_s15 }
  0x60   :  { %s470_s17 = scalar_lea.hbm %s469_s15, 1  ;;  %p473_p8 = scmp.lt.s32.totalorder %s469_s15, %s653_s1 }
  0x61   :  { %p471_p7 = scmp.ne.s32.totalorder %s469_s15, %s470_s17  ;;  %p474_p9 = scmp.lt.s32.totalorder %s583_s6, %s470_s17 }
  0x63   :  { %p475_p10 = por %p474_p9, %p473_p8 }
  0x65   :  { %p476_p11 = pnand %p475_p10, %p471_p7 }
  0x67   :  { %479 = shalt.err (!%p476_p11)  }
  0x68   :  { %149 = dma.hbm_to_vmem [thread:$0]  %s145_s14, 16, %s147_s11, [#allocation3 + $0x7] }
  0x69   :  { %518 = dma.done.wait [#allocation3], 16 }
  0x6a   :  { %519 = vsyncadd [#allocation3], 4294967280  ;;  %v153_v0 = vld [vmem:[#allocation2] sm:$0x1] }
  0x6b   :  { %520 = dma.done.wait [#allocation3 + $0x1], 16 }
  0x6c   :  { %521 = vsyncadd [#allocation3 + $0x1], 4294967280  ;;  %v157_v1 = vld [vmem:[#allocation2 + $0x1] sm:$0x1] }
  0x6d   :  { %v158_v2 = vadd.f32 %v157_v1, %v153_v0 }
  0x6e   :  { %522 = dma.done.wait [#allocation3 + $0x2], 16 }
  0x6f   :  { %523 = vsyncadd [#allocation3 + $0x2], 4294967280  ;;  %v161_v3 = vld [vmem:[#allocation2 + $0x2] sm:$0x1] }
  0x70   :  { %v162_v4 = vadd.f32 %v161_v3, %v158_v2 }
  0x71   :  { %524 = dma.done.wait [#allocation3 + $0x3], 16 }
  0x72   :  { %525 = vsyncadd [#allocation3 + $0x3], 4294967280  ;;  %v165_v5 = vld [vmem:[#allocation2 + $0x3] sm:$0x1] }
  0x73   :  { %v166_v6 = vadd.f32 %v165_v5, %v162_v4 }
  0x74   :  { %526 = dma.done.wait [#allocation3 + $0x4], 16 }
  0x75   :  { %527 = vsyncadd [#allocation3 + $0x4], 4294967280  ;;  %v169_v7 = vld [vmem:[#allocation2 + $0x4] sm:$0x1] }
  0x76   :  { %v170_v8 = vadd.f32 %v169_v7, %v166_v6 }
  0x77   :  { %528 = dma.done.wait [#allocation3 + $0x5], 16 }
  0x78   :  { %529 = vsyncadd [#allocation3 + $0x5], 4294967280  ;;  %v173_v9 = vld [vmem:[#allocation2 + $0x5] sm:$0x1] }
  0x79   :  { %v174_v10 = vadd.f32 %v173_v9, %v170_v8 }
  0x7a   :  { %530 = dma.done.wait [#allocation3 + $0x6], 16 }
  0x7b   :  { %531 = vsyncadd [#allocation3 + $0x6], 4294967280  ;;  %v177_v11 = vld [vmem:[#allocation2 + $0x6] sm:$0x1] }
  0x7c   :  { %v178_v12 = vadd.f32 %v177_v11, %v174_v10 }
  0x7d   :  { %532 = dma.done.wait [#allocation3 + $0x7], 16 }
  0x7e   :  { %533 = vsyncadd [#allocation3 + $0x7], 4294967280  ;;  %s545_s1 = smov [#allocation6]   ;;  %s191_s23 = sshll.u32 %s654_s2, 4  ;;  %v181_v13 = vld [vmem:[#allocation2 + $0x7] sm:$0x1]  ;;  %s192_s23 = int_to_ptr.hbm [resolvable:$true] %s191_s23 }
  0x7f   :  { %s189_s6 = sshll.u32 %s545_s1, 4  ;;  %v182_v14 = vadd.f32 %v181_v13, %v178_v12  ;;  %s190_s6 = int_to_ptr.vmem [resolvable:$true] %s189_s6 }
  0x81   :  { %183 = vst [vmem:[#allocation6] sm:$0x1] %v182_v14 }
  0x82   :  { %194 = dma.vmem_to_hbm [thread:$0]  %s190_s6, 16, %s192_s23, [#allocation7]  }
  0x83   :  { %534 = dma.done.wait [#allocation7], 16  }
  0x84   :  { %535 = vsyncadd [#allocation7], 4294967280 }
  0x85   :  { %199 = vsyncpa [#allocation7], 1 }
  0x86   :  { %200 = vsyncmov [#allocation3] }
  0x89   :  { %s201_s24 = vpop.sfrf %200 }
  0x8a   :  { %p270_p12 = scmp.ne.s32.totalorder %s201_s24, 0 }
  0x8c   :  { %205 = shalt.err (%p270_p12)  }
  0x8d   :  { %207 = vsyncmov [#allocation3 + $0x1] }
  0x90   :  { %s208_s25 = vpop.sfrf %207 }
  0x91   :  { %p271_p13 = scmp.ne.s32.totalorder %s208_s25, 0 }
  0x93   :  { %212 = shalt.err (%p271_p13)  }
  0x94   :  { %214 = vsyncmov [#allocation3 + $0x2] }
  0x97   :  { %s215_s26 = vpop.sfrf %214 }
  0x98   :  { %p272_p0 = scmp.ne.s32.totalorder %s215_s26, 0 }
  0x9a   :  { %219 = shalt.err (%p272_p0)  }
  0x9b   :  { %221 = vsyncmov [#allocation3 + $0x3] }
  0x9e   :  { %s222_s2 = vpop.sfrf %221 }
  0x9f   :  { %p273_p1 = scmp.ne.s32.totalorder %s222_s2, 0 }
  0xa1   :  { %226 = shalt.err (%p273_p1)  }
  0xa2   :  { %228 = vsyncmov [#allocation3 + $0x4] }
  0xa5   :  { %s229_s18 = vpop.sfrf %228 }
  0xa6   :  { %p274_p2 = scmp.ne.s32.totalorder %s229_s18, 0 }
  0xa8   :  { %233 = shalt.err (%p274_p2)  }
  0xa9   :  { %235 = vsyncmov [#allocation3 + $0x5] }
  0xac   :  { %s236_s21 = vpop.sfrf %235 }
  0xad   :  { %p275_p3 = scmp.ne.s32.totalorder %s236_s21, 0 }
  0xaf   :  { %240 = shalt.err (%p275_p3)  }
  0xb0   :  { %242 = vsyncmov [#allocation3 + $0x6] }
  0xb3   :  { %s243_s27 = vpop.sfrf %242 }
  0xb4   :  { %p276_p4 = scmp.ne.s32.totalorder %s243_s27, 0 }
  0xb6   :  { %247 = shalt.err (%p276_p4)  }
  0xb7   :  { %249 = vsyncmov [#allocation3 + $0x7] }
  0xba   :  { %s250_s28 = vpop.sfrf %249 }
  0xbb   :  { %p277_p5 = scmp.ne.s32.totalorder %s250_s28, 0 }
  0xbd   :  { %254 = shalt.err (%p277_p5)  }

</bundles_post_ra>
